<compile_context>
chip_gen: v7x
topology: tpu7x:2x2x1
jax: 0.10.0
libtpu: 0.0.40
codegen_flags: <defaults>
</compile_context>

<pallas_src>
import jax
import jax.numpy as jnp
from jax.experimental import pallas as pl
from jax.experimental.pallas import tpu as pltpu

_SCALE = 1.0 - 2.0 * 0.1   # 0.8
_SHIFT = 0.1


def _rescale_kernel(x_ref, o_ref):
    # out = 0.8 * x + 0.1 ; compute in f32 (no-op for f32 inputs, avoids
    # precision loss for bf16/fp16 inputs), cast back on store.
    x = x_ref[...].astype(jnp.float32)
    o_ref[...] = (_SCALE * x + _SHIFT).astype(o_ref.dtype)


def _sublane_multiple(itemsize: int) -> int:
    # Sub-32-bit dtypes pack 2x/4x along sublanes.
    if itemsize >= 4:
        return 8
    if itemsize == 2:
        return 16
    return 32


def rescale(img: jax.Array) -> jax.Array:
    """out = 0.8 * img + 0.1, elementwise, via a Pallas TPU kernel."""
    orig_shape = img.shape
    orig_dtype = img.dtype
    n = img.size
    itemsize = jnp.dtype(orig_dtype).itemsize

    flat = img.reshape(-1)

    LANE = 128
    bulk = (n // LANE) * LANE

    if bulk == 0:
        # Tiny (<128 elements): not worth a kernel launch.
        out = (_SCALE * flat.astype(jnp.float32) + _SHIFT).astype(orig_dtype)
        return out.reshape(orig_shape)

    # ---- wide, lane-dense 2D factorization of the 128-aligned bulk ---------
    # Widest power-of-two multiple of 128 (capped at 8192) dividing `bulk`:
    # wide lane dim -> unmasked full-width stores + big DMA descriptors.
    wide = LANE
    while wide * 2 <= 8192 and bulk % (wide * 2) == 0:
        wide *= 2
    rows = bulk // wide

    # ---- tile rows: ~2 MiB blocks, >=2 grid steps when possible ------------
    sub = _sublane_multiple(itemsize)
    target_block_bytes = 2 * 1024 * 1024
    if rows < 2 * sub:
        # Small input: one block covering the whole slab (block dims == array
        # dims, so the (8,128) divisibility constraint does not apply).
        tile_rows = rows
    else:
        cap = max(sub, (target_block_bytes // (wide * itemsize)) // sub * sub)
        # At least two grid steps so v7x megacore can shard the work.
        half = ((rows + 1) // 2 + sub - 1) // sub * sub
        tile_rows = min(cap, half)

    grid = (pl.cdiv(rows, tile_rows),)   # ragged last block handled by Pallas

    x2d = (flat[:bulk] if bulk != n else flat).reshape(rows, wide)

    out2d = pl.pallas_call(
        _rescale_kernel,
        out_shape=jax.ShapeDtypeStruct((rows, wide), orig_dtype),
        grid=grid,
        in_specs=[pl.BlockSpec((tile_rows, wide), lambda i: (i, 0))],
        out_specs=pl.BlockSpec((tile_rows, wide), lambda i: (i, 0)),
        compiler_params=pltpu.CompilerParams(
            dimension_semantics=("parallel",),
            # ~2 MiB blocks, double-buffered in+out ~= 8 MiB; 32 MiB scoped
            # limit gives headroom on v5e (default 16 MiB) and fits v6e/v7x.
            vmem_limit_bytes=32 * 1024 * 1024,
        ),
        cost_estimate=pl.CostEstimate(
            flops=2 * bulk,
            transcendentals=0,
            bytes_accessed=2 * bulk * itemsize,
        ),
    )(x2d)

    out_flat = out2d.reshape(-1)
    if bulk != n:
        # <128-element tail: plain JAX (elementwise, negligible, rare shapes).
        tail = flat[bulk:]
        tail_out = (_SCALE * tail.astype(jnp.float32) + _SHIFT).astype(orig_dtype)
        out_flat = jnp.concatenate([out_flat, tail_out])

    return out_flat.reshape(orig_shape)


if __name__ == "__main__":
    key = jax.random.PRNGKey(0)
    k0, k1 = jax.random.split(key)

    # NCHW: batch=2, channels=4, spatial=16x16
    x = jax.random.uniform(k0, (2, 4, 16, 16), dtype=jnp.float32)
    y = rescale(x)
    jax.block_until_ready(y)
    y_ref = _SCALE * x + _SHIFT
    assert y.shape == x.shape and y.dtype == x.dtype
    assert jnp.allclose(y, y_ref, atol=1e-6), "mismatch vs reference"

    # Odd-sized input: exercises ragged last block + <128-element tail path.
    x2 = jax.random.uniform(k1, (3, 3, 37, 41), dtype=jnp.float32)
    y2 = rescale(x2)
    jax.block_until_ready(y2)
    assert y2.shape == x2.shape and y2.dtype == x2.dtype
    assert jnp.allclose(y2, _SCALE * x2 + _SHIFT, atol=1e-6), "mismatch (odd shape)"

    print("KERNEL_OK")
</pallas_src>

<mosaic_0001>
module attributes {stable_mosaic.version = 11 : i64} {
  func.func @_rescale_kernel(%arg0: i32, %arg1: memref<1x2048xf32, #tpu.memory_space<vmem>>, %arg2: memref<1x2048xf32, #tpu.memory_space<vmem>>) attributes {dimension_semantics = [#tpu.dimension_semantics<parallel>], iteration_bounds = array<i64: 1>, scalar_prefetch = 0 : i64, scratch_operands = 0 : i64, tpu.core_type = #tpu.core_type<tc>, window_params = [{transform_indices = @transform_0, window_bounds = array<i64: 1, 2048>}, {transform_indices = @transform_1, window_bounds = array<i64: 1, 2048>}]} {
    %c0 = arith.constant 0 : index
    %c0_0 = arith.constant 0 : index
    %0 = vector.load %arg1[%c0, %c0_0] : memref<1x2048xf32, #tpu.memory_space<vmem>>, vector<1x2048xf32>
    %cst = arith.constant 8.000000e-01 : f32
    %1 = vector.broadcast %cst : f32 to vector<1x2048xf32>
    %2 = arith.mulf %1, %0 : vector<1x2048xf32>
    %cst_1 = arith.constant 1.000000e-01 : f32
    %3 = vector.broadcast %cst_1 : f32 to vector<1x2048xf32>
    %4 = arith.addf %2, %3 : vector<1x2048xf32>
    %c0_2 = arith.constant 0 : index
    %c0_3 = arith.constant 0 : index
    %5 = vector.load %arg2[%c0_2, %c0_3] : memref<1x2048xf32, #tpu.memory_space<vmem>>, vector<1x2048xf32>
    tpu.vector_store %arg2[%c0_2, %c0_3], %4 {strides = array<i32>} : memref<1x2048xf32, #tpu.memory_space<vmem>>, vector<1x2048xf32>,
    return
  }
  func.func @transform_0(%arg0: i32) -> (i32, i32) {
    %c0_i32 = arith.constant 0 : i32
    %c0_i32_0 = arith.constant 0 : i32
    return %arg0, %c0_i32 : i32, i32
  }
  func.func @transform_1(%arg0: i32) -> (i32, i32) {
    %c0_i32 = arith.constant 0 : i32
    %c0_i32_0 = arith.constant 0 : i32
    return %arg0, %c0_i32 : i32, i32
  }
}

</mosaic_0001>

<bundles_post_ra>
// kernel: tpu_custom_call.1
= control target key start
LH: loop header
LB: loop body
LE: loop exit
PB: predicated region body
PF: predicated region fallthrough
CT: control target
= control target key end

     0   :  { %6 = vsyncpa [#allocation3], 0  ;;  %s130_s0 = inlined_call_operand.hbm [shape: f32[1,2048], index: 0, kind: input, shape index: {}]   ;;  %s131_s1 = inlined_call_operand.hbm [shape: f32[1,2048], index: 1, kind: output, shape index: {}]  }
   0x1   :  { %7 = vsyncpa [#allocation4], 0  ;;  %s94_s6 = smov [#allocation2]   ;;  %s46_s10 = scalar_lea.hbm %s130_s0, 256 }
   0x2   :  { %s14_s7 = sshll.u32 %s94_s6, 4  ;;  %p47_p0 = scmp.ne.s32.totalorder %s130_s0, %s46_s10  ;;  %s15_s7 = int_to_ptr.vmem [resolvable:$true] %s14_s7 }
   0x3   :  { %p50_p1 = scmp.lt.u32.totalorder %s46_s10, %s130_s0 }
   0x5   :  { %p52_p2 = pnand %p50_p1, %p47_p0 }
   0x7   :  { %55 = shalt.err (!%p52_p2)
}
   0x8   :  { %s56_s15 = scalar_lea.vmem %s15_s7, 256  ;;  %p61_p4 = scmp.lt.s32.totalorder %s15_s7, %s15_s7 }
   0x9   :  { %p57_p3 = scmp.ne.s32.totalorder %s15_s7, %s56_s15  ;;  %p62_p5 = scmp.lt.s32.totalorder %s56_s15, %s56_s15 }
   0xb   :  { %p63_p6 = por %p62_p5, %p61_p4 }
   0xd   :  { %p64_p7 = pnand %p63_p6, %p57_p3 }
   0xf   :  { %67 = shalt.err (!%p64_p7)
}
  0x10   :  { %17 = dma.hbm_to_vmem [thread:$0]  %s130_s0, 256, %s15_s7, [#allocation3]  }
  0x11   :  { %90 = dma.done.wait [#allocation3], 256  }
  0x12   :  { %91 = vsyncadd [#allocation3], 4294967040  ;;  %v21_v0 = vld [vmem:[#allocation2] sm:$0xff]  ;;  %v22_v1 = vld [vmem:[#allocation2 + $0x8] sm:$0xff]  ;;  %s95_s18 = smov [#allocation5]  }
  0x13   :  { %s35_s19 = sshll.u32 %s95_s18, 4  ;;  %v23_v2 = vmul.f32 0.8, %v21_v0  ;;  %v24_v3 = vmul.f32 0.8, %v22_v1  ;;  %s36_s19 = int_to_ptr.vmem [resolvable:$true] %s35_s19 }
  0x14   :  { %s68_s20 = scalar_lea.vmem %s36_s19, 256  ;;  %p73_p9 = scmp.lt.s32.totalorder %s36_s19, %s36_s19 }
  0x15   :  { %v25_v4 = vadd.f32 0.1, %v23_v2  ;;  %v26_v5 = vadd.f32 0.1, %v24_v3  ;;  %p69_p8 = scmp.ne.s32.totalorder %s36_s19, %s68_s20  ;;  %p74_p10 = scmp.lt.s32.totalorder %s68_s20, %s68_s20 }
  0x17   :  { %27 = vst [vmem:[#allocation5] sm:$0xff] %v25_v4  ;;  %28 = vst [vmem:[#allocation5 + $0x8] sm:$0xff] %v26_v5  ;;  %p75_p11 = por %p74_p10, %p73_p9 }
  0x19   :  { %p76_p12 = pnand %p75_p11, %p69_p8 }
  0x1b   :  { %79 = shalt.err (!%p76_p12)
}
  0x1c   :  { %s80_s22 = scalar_lea.hbm %s131_s1, 256 }
  0x1d   :  { %p81_p13 = scmp.ne.s32.totalorder %s131_s1, %s80_s22  ;;  %p84_p0 = scmp.lt.u32.totalorder %s80_s22, %s131_s1 }
  0x1f   :  { %p86_p1 = pnand %p84_p0, %p81_p13 }
  0x21   :  { %89 = shalt.err (!%p86_p1)
}
  0x22   :  { %38 = dma.vmem_to_hbm [thread:$0]  %s36_s19, 256, %s131_s1, [#allocation4]  }
  0x23   :  { %92 = dma.done.wait [#allocation4], 256  }
  0x24   :  { %93 = vsyncadd [#allocation4], 4294967040 }
  0x25   :  { %42 = vsyncpa [#allocation3], 1 }
  0x26   :  { %43 = vsyncpa [#allocation4], 1 }

</bundles_post_ra>
